<compile_context>
chip_gen: v5e
topology: v5e:2x2
jax: 0.10.0
libtpu: 0.0.40
codegen_flags: <defaults>
</compile_context>

<pallas_src>
import functools

import jax
import jax.numpy as jnp
from jax.experimental import pallas as pl
from jax.experimental.pallas import tpu as pltpu


def _gcn_kernel(x_ref, a_ref, w2_ref, bias_ref, o_ref):
    # x_ref:    (S, LB)   lane-dense activation slab for one batch block (LB = block_batch*N)
    # a_ref:    (LB, LB)  folded conv1 weight: kron(I_bb, W1^T) - I  (residual folded in)
    # w2_ref:   (S, S)    conv2 weight
    # bias_ref: (S, LB)   conv1 bias pushed through conv2: rowsum(W2) outer tile(b1)
    h = jnp.dot(x_ref[...], a_ref[...], preferred_element_type=jnp.float32)
    out = jnp.dot(w2_ref[...], h, preferred_element_type=jnp.float32) + bias_ref[...]
    o_ref[...] = jnp.maximum(out, 0.0).astype(o_ref.dtype)


def fold_gcn_params(w1, b1, w2, *, num_node, block_batch):
    """Precompute folded GCN weights. Call ONCE at init, not per forward.

    w1: (N, N) conv1 weight, b1: (N,) conv1 bias, w2: (S, S) conv2 weight.
    Returns (A, W2, bias) with A: (block_batch*N, block_batch*N),
    bias: (S, block_batch*N).
    """
    n = num_node
    lb = block_batch * n
    eye_bb = jnp.eye(block_batch, dtype=w1.dtype)
    # kron(I, W1^T)[b*N+m, b*N+n] = W1[n, m]; subtracting I folds the residual (h - x).
    a = jnp.kron(eye_bb, w1.T) - jnp.eye(lb, dtype=w1.dtype)
    # W2 @ broadcast(b1) == rowsum(W2)[:, None] * tile(b1)[None, :]
    bias = jnp.sum(w2, axis=1)[:, None] * jnp.tile(b1, block_batch)[None, :]
    return a, w2, bias.astype(w1.dtype)


def gcn_forward_slab(x_slab, a, w2, bias, *, block_batch, num_node):
    """GCN forward on a lane-dense (S, Bp*N) slab; Bp must be a multiple of block_batch."""
    s, bn_total = x_slab.shape
    lb = block_batch * num_node
    assert bn_total % lb == 0, "batch (after padding) must be a multiple of block_batch"
    num_blocks = bn_total // lb

    itemsize = jnp.dtype(x_slab.dtype).itemsize
    flops = num_blocks * (2 * s * lb * lb + 2 * s * s * lb)
    bytes_accessed = int(
        2 * s * bn_total * itemsize                      # x in + out
        + (a.size + w2.size + bias.size) * itemsize)     # weights (loaded once)

    return pl.pallas_call(
        _gcn_kernel,
        out_shape=jax.ShapeDtypeStruct((s, bn_total), x_slab.dtype),
        grid=(num_blocks,),
        in_specs=[
            pl.BlockSpec((s, lb), lambda i: (0, i)),      # activations: block i of lanes
            pl.BlockSpec((lb, lb), lambda i: (0, 0)),     # folded conv1 weight (shared)
            pl.BlockSpec((s, s), lambda i: (0, 0)),       # conv2 weight (shared)
            pl.BlockSpec((s, lb), lambda i: (0, 0)),      # folded bias (shared)
        ],
        out_specs=pl.BlockSpec((s, lb), lambda i: (0, i)),
        compiler_params=pltpu.CompilerParams(
            dimension_semantics=("parallel",)),           # batch blocks are independent
        cost_estimate=pl.CostEstimate(
            flops=flops, transcendentals=0, bytes_accessed=bytes_accessed),
    )(x_slab, a, w2, bias)


def gcn_forward(x, a, w2, bias, *, block_batch):
    """GCN forward matching the PyTorch (B, S, N) layout.

    NOTE: prefer gcn_forward_slab and keep the (S, B*N) slab as the interchange
    format with the surrounding HAINet matmuls; the transposes here exist only
    to match the PyTorch calling convention for the standalone test.
    """
    b, s, n = x.shape
    bp = ((b + block_batch - 1) // block_batch) * block_batch
    if bp != b:
        # Zero pad-lanes: they stay block-isolated under the block-diagonal A and
        # column-wise W2, and are sliced off below, so garbage never reaches output.
        x = jnp.concatenate([x, jnp.zeros((bp - b, s, n), x.dtype)], axis=0)
    x_slab = jnp.transpose(x, (1, 0, 2)).reshape(s, bp * n)
    out_slab = gcn_forward_slab(x_slab, a, w2, bias,
                                block_batch=block_batch, num_node=n)
    out = out_slab.reshape(s, bp, n).transpose(1, 0, 2)
    return out[:b]


def gcn_reference(x, w1, b1, w2):
    # Pure-JAX reference matching the PyTorch GCN forward.
    h1 = jnp.einsum('bsm,nm->bsn', x, w1) + b1[None, None, :]
    h = h1 - x
    out = jnp.einsum('st,btn->bsn', w2, h)
    return jnp.maximum(out, 0.0)


if __name__ == "__main__":
    # Shapes consistent with HAINet's GFAM/GLFEM usage: mids=4 -> num_s = num_n = 16.
    num_state = 16   # S
    num_node = 16    # N
    block_batch = 8  # 8 * 16 = 128 lanes per grid step (>=128 -> unmasked stores)

    key = jax.random.PRNGKey(0)
    kx, k1, kb, k2, kx2 = jax.random.split(key, 5)

    w1 = jax.random.normal(k1, (num_node, num_node), dtype=jnp.float32) * 0.1
    b1 = jax.random.normal(kb, (num_node,), dtype=jnp.float32) * 0.1
    w2 = jax.random.normal(k2, (num_state, num_state), dtype=jnp.float32) * 0.1

    # Fold weights once at init (conv1^T block-diag + residual, bias through conv2).
    a_blk, w2_f, bias_blk = fold_gcn_params(
        w1, b1, w2, num_node=num_node, block_batch=block_batch)

    fwd = jax.jit(functools.partial(gcn_forward, block_batch=block_batch))

    # Case 1: batch filling two 128-lane grid blocks (exercises the parallel grid).
    B = 16
    x = jax.random.normal(kx, (B, num_state, num_node), dtype=jnp.float32)
    out = jax.block_until_ready(fwd(x, a_blk, w2_f, bias_blk))
    ref = gcn_reference(x, w1, b1, w2)
    assert out.shape == (B, num_state, num_node)
    assert jnp.allclose(out, ref, atol=1e-4, rtol=1e-4), "mismatch vs reference (B=16)"

    # Case 2: tiny batch (B=2, as in the original test) -> padded to one 128-lane block.
    B2 = 2
    x2 = jax.random.normal(kx2, (B2, num_state, num_node), dtype=jnp.float32)
    out2 = jax.block_until_ready(fwd(x2, a_blk, w2_f, bias_blk))
    ref2 = gcn_reference(x2, w1, b1, w2)
    assert out2.shape == (B2, num_state, num_node)
    assert jnp.allclose(out2, ref2, atol=1e-4, rtol=1e-4), "mismatch vs reference (B=2)"

    print("KERNEL_OK")
</pallas_src>

<mosaic_0001>
module attributes {stable_mosaic.version = 11 : i64} {
  func.func @_gcn_kernel(%arg0: i32, %arg1: memref<16x128xf32, #tpu.memory_space<vmem>>, %arg2: memref<128x128xf32, #tpu.memory_space<vmem>>, %arg3: memref<16x16xf32, #tpu.memory_space<vmem>>, %arg4: memref<16x128xf32, #tpu.memory_space<vmem>>, %arg5: memref<16x128xf32, #tpu.memory_space<vmem>>) attributes {dimension_semantics = [#tpu.dimension_semantics<parallel>], iteration_bounds = array<i64: 2>, scalar_prefetch = 0 : i64, scratch_operands = 0 : i64, tpu.core_type = #tpu.core_type<tc>, window_params = [{transform_indices = @transform_0, window_bounds = array<i64: 16, 128>}, {pipeline_mode = #tpu.pipeline_mode<synchronous>, transform_indices = @transform_1, window_bounds = array<i64: 128, 128>}, {pipeline_mode = #tpu.pipeline_mode<synchronous>, transform_indices = @transform_2, window_bounds = array<i64: 16, 16>}, {pipeline_mode = #tpu.pipeline_mode<synchronous>, transform_indices = @transform_3, window_bounds = array<i64: 16, 128>}, {transform_indices = @transform_4, window_bounds = array<i64: 16, 128>}]} {
    %c0 = arith.constant 0 : index
    %c0_0 = arith.constant 0 : index
    %0 = vector.load %arg1[%c0, %c0_0] : memref<16x128xf32, #tpu.memory_space<vmem>>, vector<16x128xf32>
    %c0_1 = arith.constant 0 : index
    %c0_2 = arith.constant 0 : index
    %1 = vector.load %arg2[%c0_1, %c0_2] : memref<128x128xf32, #tpu.memory_space<vmem>>, vector<128x128xf32>
    %cst = arith.constant dense<0.000000e+00> : vector<16x128xf32>
    %2 = tpu.matmul %0, %1, %cst {dimension_numbers = #tpu.dot_dimension_numbers<[1], [0], [0], [1], [0, 0, 1, 1], [], []>} : vector<16x128xf32>, vector<128x128xf32>, vector<16x128xf32> -> vector<16x128xf32>
    %c0_3 = arith.constant 0 : index
    %c0_4 = arith.constant 0 : index
    %3 = vector.load %arg3[%c0_3, %c0_4] : memref<16x16xf32, #tpu.memory_space<vmem>>, vector<16x16xf32>
    %cst_5 = arith.constant dense<0.000000e+00> : vector<16x128xf32>
    %4 = tpu.matmul %3, %2, %cst_5 {dimension_numbers = #tpu.dot_dimension_numbers<[1], [0], [0], [1], [0, 0, 1, 1], [], []>} : vector<16x16xf32>, vector<16x128xf32>, vector<16x128xf32> -> vector<16x128xf32>
    %c0_6 = arith.constant 0 : index
    %c0_7 = arith.constant 0 : index
    %5 = vector.load %arg4[%c0_6, %c0_7] : memref<16x128xf32, #tpu.memory_space<vmem>>, vector<16x128xf32>
    %6 = arith.addf %4, %5 : vector<16x128xf32>
    %cst_8 = arith.constant 0.000000e+00 : f32
    %7 = vector.broadcast %cst_8 : f32 to vector<16x128xf32>
    %8 = arith.maximumf %6, %7 : vector<16x128xf32>
    %c0_9 = arith.constant 0 : index
    %c0_10 = arith.constant 0 : index
    %9 = vector.load %arg5[%c0_9, %c0_10] : memref<16x128xf32, #tpu.memory_space<vmem>>, vector<16x128xf32>
    tpu.vector_store %arg5[%c0_9, %c0_10], %8 {strides = array<i32>} : memref<16x128xf32, #tpu.memory_space<vmem>>, vector<16x128xf32>,
    return
  }
  func.func @transform_0(%arg0: i32) -> (i32, i32) {
    %c0_i32 = arith.constant 0 : i32
    %c0_i32_0 = arith.constant 0 : i32
    return %c0_i32, %arg0 : i32, i32
  }
  func.func @transform_1(%arg0: i32) -> (i32, i32) {
    %c0_i32 = arith.constant 0 : i32
    %c0_i32_0 = arith.constant 0 : i32
    %c0_i32_1 = arith.constant 0 : i32
    return %c0_i32, %c0_i32_0 : i32, i32
  }
  func.func @transform_2(%arg0: i32) -> (i32, i32) {
    %c0_i32 = arith.constant 0 : i32
    %c0_i32_0 = arith.constant 0 : i32
    %c0_i32_1 = arith.constant 0 : i32
    return %c0_i32, %c0_i32_0 : i32, i32
  }
  func.func @transform_3(%arg0: i32) -> (i32, i32) {
    %c0_i32 = arith.constant 0 : i32
    %c0_i32_0 = arith.constant 0 : i32
    %c0_i32_1 = arith.constant 0 : i32
    return %c0_i32, %c0_i32_0 : i32, i32
  }
  func.func @transform_4(%arg0: i32) -> (i32, i32) {
    %c0_i32 = arith.constant 0 : i32
    %c0_i32_0 = arith.constant 0 : i32
    return %c0_i32, %arg0 : i32, i32
  }
}

</mosaic_0001>

<bundles_post_ra>
// kernel: gcn_forward.1
= control target key start
LH: loop header
LB: loop body
LE: loop exit
PB: predicated region body
PF: predicated region fallthrough
CT: control target
= control target key end

     0   :  { %s516_s15 = smov 0   ;;  %s518_s16 = smov 0   ;;  %s636_s0 = inlined_call_operand.vmem [shape: f32[16,256], index: 0, kind: input, shape index: {}]   ;;  %s637_s1 = inlined_call_operand.vmem [shape: f32[128,128], index: 1, kind: input, shape index: {}]   ;;  %s638_s2 = inlined_call_operand.vmem [shape: f32[16,16], index: 2, kind: input, shape index: {}]   ;;  %s639_s3 = inlined_call_operand.vmem [shape: f32[16,128], index: 3, kind: input, shape index: {}]   ;;  %s640_s4 = inlined_call_operand.vmem [shape: f32[16,256], index: 4, kind: output, shape index: {}]  }
   0x1   :  { %s520_s17 = smov 0  }
   0x2 LB: > { %s412_s18 = sadd.s32 4294967295, %s489_s17   ;;  %s533_s19 = sadd.s32 1, %s489_s17   ;;  %s489_s17 = sphi %s520_s17, %s644_s17   ;;  %s485_s16 = sphi %s518_s16, %s643_s16   ;;  %s481_s15 = sphi %s516_s15, %s642_s15  }
   0x3   : > { %s18_s20 = ssub.s32 %s489_s17, %s533_s19  ;;  %s21_s21 = sadd.s32 1, %s485_s16 }
   0x4   : > { %p19_p0 = scmp.eq.s32.totalorder %s18_s20, 0  ;;  %p28_p1 = scmp.ne.s32.totalorder %s485_s16, %s481_s15 }
   0x5   : > { %p29_p2 = scmp.eq.s32.totalorder %s489_s17, 0  ;;  %p121_p3 = scmp.eq.s32.totalorder %s412_s18, 1 }
   0x6   : > { %s544_s22 = scalar_select %p19_p0, %s485_s16, %s21_s21  }
   0x7   : > { %p30_p4 = por %p29_p2, %p28_p1  ;;  %p546_p5 = por %p121_p3, %p28_p1 }
   0x8   : > { %p415_p6 = scmp.ge.s32.totalorder %s489_s17, 2 }
   0xa   : > { %152 = sbr.rel (%p415_p6) target bundleno = 21 (0x15), region = 28 }
   0xf   : > { %155 = sbr.rel (!%p30_p4) target bundleno = 21 (0x15), region = 32  ;;  %s157_s24 = sand.u32 (%p30_p4), 1, %s485_s16  }
  0x10   : > { %s417_s25 = sshll.u32 (%p30_p4), %s489_s17, 3  ;;  %s416_s26 = sshll.u32 (%p30_p4), %s157_s24, 4 }
  0x11   : > { %s161_s29 = scalar_lea.vmem (%p30_p4), %s636_s0, %s417_s25  ;;  %s159_s30 = scalar_lea.vmem (%p30_p4), [#allocation2], %s416_s26 }
  0x12   : > { %v192_v0 = vld [vmem:[%s161_s29] sm:$0xff] (%p30_p4)  ;;  %v194_v1 = vld [vmem:[%s161_s29 + $0x10] sm:$0xff] (%p30_p4) }
  0x13   : > { %193 = vst [vmem:[%s159_s30] sm:$0xff] (%p30_p4), %v192_v0 }
  0x14   : > { %195 = vst [vmem:[%s159_s30 + $0x8] sm:$0xff] %v194_v1 }
  0x15 PF: > { %p418_p7 = scmp.ge.s32.totalorder %s489_s17, 1  ;;  %p200_p8 = scmp.lt.s32.totalorder %s489_s17, 3 }
  0x17   : > { %p201_p9 = pnand %p418_p7, %p200_p8 }
  0x18   : > { %s207_s10 = sand.u32 (!%p201_p9), 1, %s481_s15  }
  0x19   : > { %204 = sbr.rel (%p201_p9) target bundleno = 344 (0x158), region = 70  ;;  %s419_s13 = sshll.u32 (!%p201_p9), %s207_s10, 4 }
  0x1a   : > { %s209_s26 = scalar_lea.vmem (!%p201_p9), [#allocation2], %s419_s13  ;;  %s230_s7 = scalar_lea.vmem (!%p201_p9), [#allocation3], %s419_s13 }
  0x1e   : > { %v248_v2 = vld [vmem:[%s637_s1 + $0x78] sm:$0xff]  ;;  %v247_v3 = vld [vmem:[%s637_s1 + $0x70] sm:$0xff]  ;;  %v246_v4 = vld [vmem:[%s637_s1 + $0x68] sm:$0xff]  ;;  %vm276_vm0 = vcmask 130048   ;;  %s424_s10 = sshll.u32 (%p546_p5), %s412_s18, 3 }
  0x1f   : > { %427 = vmatpush.msra.mxu2 %v248_v2  ;;  %249 = vmatpush.msra.mxu0 %v248_v2  ;;  %v245_v5 = vld [vmem:[%s637_s1 + $0x60] sm:$0xff]  ;;  %v244_v6 = vld [vmem:[%s637_s1 + $0x58] sm:$0xff]  ;;  %v243_v7 = vld [vmem:[%s637_s1 + $0x50] sm:$0xff]  ;;  %s318_s13 = scalar_lea.vmem (%p546_p5), %s640_s4, %s424_s10 }
  0x20   : > { %v242_v8 = vld [vmem:[%s637_s1 + $0x48] sm:$0xff]  ;;  %v241_v9 = vld [vmem:[%s637_s1 + $0x40] sm:$0xff]  ;;  %v240_v10 = vld [vmem:[%s637_s1 + $0x38] sm:$0xff] }
  0x21   : > { %428 = vmatpush.msra.mxu2 %v247_v3  ;;  %250 = vmatpush.msra.mxu0 %v247_v3  ;;  %v239_v11 = vld [vmem:[%s637_s1 + $0x30] sm:$0xff]  ;;  %v238_v12 = vld [vmem:[%s637_s1 + $0x28] sm:$0xff]  ;;  %v237_v13 = vld [vmem:[%s637_s1 + $0x20] sm:$0xff] }
  0x22   : > { %v236_v14 = vld [vmem:[%s637_s1 + $0x18] sm:$0xff]  ;;  %v235_v15 = vld [vmem:[%s637_s1 + $0x10] sm:$0xff]  ;;  %v234_v16 = vld [vmem:[%s637_s1 + $0x8] sm:$0xff] }
  0x23   : > { %429 = vmatpush.msra.mxu2 %v246_v4  ;;  %251 = vmatpush.msra.mxu0 %v246_v4  ;;  %v233_v17 = vld [vmem:[%s637_s1] sm:$0xff]  ;;  %v232_v18 = vld [vmem:[%s209_s26 + $0x8] sm:$0xff] }
  0x24   : > { %v231_v19 = vld [vmem:[%s209_s26] sm:$0xff]  ;;  %v273_v23 = vld [vmem:[%s638_s2 + $0x8] sm:$0xff] }
  0x25   : > { %430 = vmatpush.msra.mxu2 %v245_v5  ;;  %252 = vmatpush.msra.mxu0 %v245_v5  ;;  %v272_v22 = vld [vmem:[%s638_s2] sm:$0xff]  ;;  %v275_v28 = vld [vmem:[%s639_s3 + $0x8] sm:$0xff] }
  0x26   : > { %v274_v24 = vld [vmem:[%s639_s3] sm:$0xff] }
  0x27   : > { %431 = vmatpush.msra.mxu2 %v244_v6  ;;  %253 = vmatpush.msra.mxu0 %v244_v6 }
  0x29   : > { %432 = vmatpush.msra.mxu2 %v243_v7  ;;  %254 = vmatpush.msra.mxu0 %v243_v7 }
  0x2b   : > { %433 = vmatpush.msra.mxu2 %v242_v8  ;;  %255 = vmatpush.msra.mxu0 %v242_v8 }
  0x2d   : > { %434 = vmatpush.msra.mxu2 %v241_v9  ;;  %256 = vmatpush.msra.mxu0 %v241_v9 }
  0x2f   : > { %435 = vmatpush.msra.mxu2 %v240_v10  ;;  %257 = vmatpush.msra.mxu0 %v240_v10 }
  0x31   : > { %436 = vmatpush.msra.mxu2 %v239_v11  ;;  %258 = vmatpush.msra.mxu0 %v239_v11 }
  0x33   : > { %437 = vmatpush.msra.mxu2 %v238_v12  ;;  %259 = vmatpush.msra.mxu0 %v238_v12 }
  0x35   : > { %438 = vmatpush.msra.mxu2 %v237_v13  ;;  %260 = vmatpush.msra.mxu0 %v237_v13 }
  0x37   : > { %439 = vmatpush.msra.mxu2 %v236_v14  ;;  %261 = vmatpush.msra.mxu0 %v236_v14 }
  0x39   : > { %440 = vmatpush.msra.mxu2 %v235_v15  ;;  %262 = vmatpush.msra.mxu0 %v235_v15 }
  0x3b   : > { %441 = vmatpush.msra.mxu2 %v234_v16  ;;  %263 = vmatpush.msra.mxu0 %v234_v16 }
  0x3d   : > { %442 = vmatpush.msra.mxu2 %v233_v17  ;;  %264 = vmatpush.msra.mxu0 %v233_v17 }
  0x3e   : > { %268 = vmatmul.f32.vlgmr.msra.gmra.mxu2 %v232_v18  ;;  %265 = vmatmul.f32.vlgmr.msra.gmra.mxu0 %v231_v19 }
  0xbb   : > { %v266_v21 = vpop.f32.mrf.mxu0 }
  0xc1   : > { %v269_v20 = vpop.f32.mrf.mxu2 }
  0xc2   : > { %297 = vmatpush.msra.mxu1 %v269_v20 }
  0xc4   : > { %298 = vmatpush.msra.mxu1 %v266_v21 }
  0xc5   : > { %421 = vmatmul.msk.f32.vlgmr.msra.gmra.mxu1 %vm276_vm0, %v272_v22 }
  0xcd   : > { %422 = vmatmul.msk.f32.gmra.mxu1 %vm276_vm0, %v273_v23 }
 0x142   : > { %v300_v25 = vpop.f32.mrf.mxu1 }
 0x143   : > { %v301_v26 = vadd.f32 %v300_v25, %v274_v24 }
 0x145   : > { %v306_v27 = vmax.f32 %v301_v26, 0.0 }
 0x147   : > { %308 = vst [vmem:[%s230_s7] sm:$0xff] %v306_v27 }
 0x14a   : > { %v303_v29 = vpop.f32.mrf.mxu1 }
 0x14b   : > { %v304_v30 = vadd.f32 %v303_v29, %v275_v28  ;;  %316 = sbr.rel (!%p546_p5) target bundleno = 344 (0x158), region = 78 }
 0x14d   : > { %v307_v31 = vmax.f32 %v304_v30, 0.0 }
 0x14e   : > { %v349_v32 = vld [vmem:[%s230_s7] sm:$0xff] (%p546_p5) }
 0x14f   : > { %309 = vst [vmem:[%s230_s7 + $0x8] sm:$0xff] %v307_v31 }
 0x150   : > { %350 = vst [vmem:[%s318_s13] sm:$0xff] %v349_v32 }
 0x156   : > { %v351_v33 = vld [vmem:[%s230_s7 + $0x8] sm:$0xff] }
 0x157   : > { %352 = vst [vmem:[%s318_s13 + $0x10] sm:$0xff] %v351_v33 }
 0x158 PF: > { %p11_p10 = scmp.ge.s32.totalorder %s533_s19, 4   ;;  %s642_s15 = smov %s485_s16 }
 0x159   : > { %s643_s16 = smov %s544_s22  ;;  %s644_s17 = smov %s533_s19 }
 0x15a   :  { %13 = sbr.rel (!%p11_p10) target bundleno = 2 (0x2), region = 147 }

</bundles_post_ra>
